<compile_context>
chip_gen: v5e
topology: v5e:2x2
jax: 0.10.0
libtpu: 0.0.40
codegen_flags: <defaults>
</compile_context>

<pallas_src>
import functools

import jax
import jax.numpy as jnp
from jax.experimental import pallas as pl
from jax.experimental.pallas import tpu as pltpu  # noqa: F401  (TPU backend)

BN_EPS = 1e-5
LANE = 128


def _shot_clip_kernel(frames_ref, w1_ref, vecs_ref, w2_ref, out_ref, *, hp, cp):
    # --- average of the three key-frame features -------------------------
    f = frames_ref[...]                                   # [3, B, D]
    avg = (f[0] + f[1] + f[2]) * (1.0 / 3.0)              # [B, D]

    # --- Linear(D -> H_pad); b1 omitted (cancelled by BN mean subtraction)
    h = jnp.dot(avg, w1_ref[...], preferred_element_type=jnp.float32)  # [B, Hp]

    # --- BatchNorm1d, training mode: one-pass batch stats, biased variance
    inv_n = 1.0 / h.shape[0]
    mean = jnp.sum(h, axis=0, keepdims=True) * inv_n                   # [1, Hp]
    ex2 = jnp.sum(h * h, axis=0, keepdims=True) * inv_n                # [1, Hp]
    var = jnp.maximum(ex2 - mean * mean, 0.0)

    gamma = vecs_ref[0:1, :hp]                            # [1, Hp]
    beta = vecs_ref[1:2, :hp]                             # [1, Hp]
    b2 = vecs_ref[2:3, :cp]                               # [1, Cp]

    scale = gamma * jax.lax.rsqrt(var + BN_EPS)           # fold gamma into scale
    h = (h - mean) * scale + beta

    # --- ReLU -------------------------------------------------------------
    h = jnp.maximum(h, 0.0)

    # --- Linear(H_pad -> C_pad) + bias; padded rows/cols of w2 are zero ----
    out = jnp.dot(h, w2_ref[...], preferred_element_type=jnp.float32)  # [B, Cp]
    out_ref[...] = out + b2


def trailer_shot_clipmodel_forward(f0, f1, f2, params):
    """f0, f1, f2: [B, img_feat_dim] float32. Returns [B, num_category]."""
    B, D = f0.shape
    w1, gamma, beta, w2, b2 = (params["w1"], params["gamma"], params["beta"],
                               params["w2"], params["b2"])
    H = w1.shape[1]
    C = w2.shape[1]
    Hp = pl.cdiv(H, LANE) * LANE          # lane-padded hidden width
    Cp = pl.cdiv(C, LANE) * LANE          # lane-padded output width
    Vp = max(Hp, Cp)

    # One stacked key-frame input: 3 DMA descriptors -> 1.
    frames = jnp.stack([f0, f1, f2], axis=0)                       # [3, B, D]

    # Lane-pad the weight matrices with zeros (keeps the math exact).
    w1_pad = jnp.zeros((D, Hp), jnp.float32).at[:, :H].set(w1)
    w2_pad = jnp.zeros((Hp, Cp), jnp.float32).at[:H, :C].set(w2)

    # Pack the small per-feature vectors into a single [3, Vp] array.
    vecs = jnp.zeros((3, Vp), jnp.float32)
    vecs = vecs.at[0, :H].set(gamma.reshape(-1))
    vecs = vecs.at[1, :H].set(beta.reshape(-1))
    vecs = vecs.at[2, :C].set(b2.reshape(-1))

    full = lambda shape: pl.BlockSpec(shape, lambda: tuple(0 for _ in shape))

    out_pad = pl.pallas_call(
        functools.partial(_shot_clip_kernel, hp=Hp, cp=Cp),
        out_shape=jax.ShapeDtypeStruct((B, Cp), jnp.float32),
        grid=(),  # single VMEM tile at these shapes
        in_specs=[
            full((3, B, D)),       # stacked key-frame features
            full((D, Hp)),         # w1 (lane-padded)
            full((3, Vp)),         # packed gamma / beta / b2
            full((Hp, Cp)),        # w2 (lane-padded)
        ],
        out_specs=full((B, Cp)),   # lane-dense output store
    )(frames, w1_pad, vecs, w2_pad)

    return out_pad[:, :C]


def init_params(key, img_feat_dim, hidden_dim, num_category):
    """Deterministic synthetic parameters (weights stored as [in, out])."""
    k1, k2, k3, k4, k5, k6 = jax.random.split(key, 6)
    w1 = jax.random.normal(k1, (img_feat_dim, hidden_dim), jnp.float32) * 0.05
    b1 = jax.random.normal(k2, (1, hidden_dim), jnp.float32) * 0.05
    gamma = 1.0 + 0.1 * jax.random.normal(k3, (1, hidden_dim), jnp.float32)
    beta = 0.1 * jax.random.normal(k4, (1, hidden_dim), jnp.float32)
    w2 = jax.random.normal(k5, (hidden_dim, num_category), jnp.float32) * 0.05
    b2 = jax.random.normal(k6, (1, num_category), jnp.float32) * 0.05
    return {"w1": w1, "b1": b1, "gamma": gamma, "beta": beta,
            "w2": w2, "b2": b2}


def reference_forward(f0, f1, f2, params):
    """Plain-JAX reference, faithful to the PyTorch module (b1 included)."""
    avg = (f0 + f1 + f2) / 3.0
    h = avg @ params["w1"] + params["b1"]
    mean = jnp.mean(h, axis=0, keepdims=True)
    var = jnp.mean((h - mean) ** 2, axis=0, keepdims=True)
    h = (h - mean) / jnp.sqrt(var + BN_EPS)
    h = h * params["gamma"] + params["beta"]
    h = jnp.maximum(h, 0.0)
    return h @ params["w2"] + params["b2"]


if __name__ == "__main__":
    # Small shapes consistent with the module's forward signature.
    B, IMG_FEAT_DIM, HIDDEN_DIM, NUM_CATEGORY = 8, 32, 32, 21

    key = jax.random.PRNGKey(0)
    kf0, kf1, kf2, kp = jax.random.split(key, 4)
    f0 = jax.random.normal(kf0, (B, IMG_FEAT_DIM), jnp.float32)
    f1 = jax.random.normal(kf1, (B, IMG_FEAT_DIM), jnp.float32)
    f2 = jax.random.normal(kf2, (B, IMG_FEAT_DIM), jnp.float32)

    params = init_params(kp, IMG_FEAT_DIM, HIDDEN_DIM, NUM_CATEGORY)

    out = trailer_shot_clipmodel_forward(f0, f1, f2, params)
    out = jax.block_until_ready(out)

    ref = reference_forward(f0, f1, f2, params)
    assert out.shape == (B, NUM_CATEGORY)
    assert jnp.allclose(out, ref, atol=1e-4, rtol=1e-4), \
        float(jnp.max(jnp.abs(out - ref)))

    print("KERNEL_OK")
</pallas_src>

<mosaic_0001>
module attributes {stable_mosaic.version = 11 : i64} {
  func.func @_shot_clip_kernel(%arg0: memref<3x8x32xf32, #tpu.memory_space<vmem>>, %arg1: memref<32x128xf32, #tpu.memory_space<vmem>>, %arg2: memref<3x128xf32, #tpu.memory_space<vmem>>, %arg3: memref<128x128xf32, #tpu.memory_space<vmem>>, %arg4: memref<8x128xf32, #tpu.memory_space<vmem>>) attributes {dimension_semantics = [], scalar_prefetch = 0 : i64, scratch_operands = 0 : i64, tpu.core_type = #tpu.core_type<tc>} {
    %c0 = arith.constant 0 : index
    %c0_0 = arith.constant 0 : index
    %c0_1 = arith.constant 0 : index
    %0 = vector.load %arg0[%c0, %c0_0, %c0_1] : memref<3x8x32xf32, #tpu.memory_space<vmem>>, vector<3x8x32xf32>
    %1 = vector.extract_strided_slice %0 {offsets = [0, 0, 0], sizes = [1, 8, 32], strides = [1, 1, 1]} : vector<3x8x32xf32> to vector<1x8x32xf32>
    %2 = vector.shape_cast %1 : vector<1x8x32xf32> to vector<8x32xf32>
    %3 = vector.extract_strided_slice %0 {offsets = [1, 0, 0], sizes = [1, 8, 32], strides = [1, 1, 1]} : vector<3x8x32xf32> to vector<1x8x32xf32>
    %4 = vector.shape_cast %3 : vector<1x8x32xf32> to vector<8x32xf32>
    %5 = arith.addf %2, %4 : vector<8x32xf32>
    %6 = vector.extract_strided_slice %0 {offsets = [2, 0, 0], sizes = [1, 8, 32], strides = [1, 1, 1]} : vector<3x8x32xf32> to vector<1x8x32xf32>
    %7 = vector.shape_cast %6 : vector<1x8x32xf32> to vector<8x32xf32>
    %8 = arith.addf %5, %7 : vector<8x32xf32>
    %cst = arith.constant 0.333333343 : f32
    %9 = vector.broadcast %cst : f32 to vector<8x32xf32>
    %10 = arith.mulf %8, %9 : vector<8x32xf32>
    %c0_2 = arith.constant 0 : index
    %c0_3 = arith.constant 0 : index
    %11 = vector.load %arg1[%c0_2, %c0_3] : memref<32x128xf32, #tpu.memory_space<vmem>>, vector<32x128xf32>
    %cst_4 = arith.constant dense<0.000000e+00> : vector<8x128xf32>
    %12 = tpu.matmul %10, %11, %cst_4 {dimension_numbers = #tpu.dot_dimension_numbers<[1], [0], [0], [1], [0, 0, 1, 1], [], []>} : vector<8x32xf32>, vector<32x128xf32>, vector<8x128xf32> -> vector<8x128xf32>
    %cst_5 = arith.constant dense<0.000000e+00> : vector<128xf32>
    %13 = vector.multi_reduction <add>, %12, %cst_5 [0] : vector<8x128xf32> to vector<128xf32>
    %14 = vector.shape_cast %13 : vector<128xf32> to vector<1x128xf32>
    %cst_6 = arith.constant 1.250000e-01 : f32
    %15 = vector.broadcast %cst_6 : f32 to vector<1x128xf32>
    %16 = arith.mulf %14, %15 : vector<1x128xf32>
    %17 = arith.mulf %12, %12 : vector<8x128xf32>
    %cst_7 = arith.constant dense<0.000000e+00> : vector<128xf32>
    %18 = vector.multi_reduction <add>, %17, %cst_7 [0] : vector<8x128xf32> to vector<128xf32>
    %19 = vector.shape_cast %18 : vector<128xf32> to vector<1x128xf32>
    %cst_8 = arith.constant 1.250000e-01 : f32
    %20 = vector.broadcast %cst_8 : f32 to vector<1x128xf32>
    %21 = arith.mulf %19, %20 : vector<1x128xf32>
    %22 = arith.mulf %16, %16 : vector<1x128xf32>
    %23 = arith.subf %21, %22 : vector<1x128xf32>
    %cst_9 = arith.constant 0.000000e+00 : f32
    %24 = vector.broadcast %cst_9 : f32 to vector<1x128xf32>
    %25 = arith.maximumf %23, %24 : vector<1x128xf32>
    %c0_10 = arith.constant 0 : index
    %c0_11 = arith.constant 0 : index
    %26 = vector.load %arg2[%c0_10, %c0_11] : memref<3x128xf32, #tpu.memory_space<vmem>>, vector<1x128xf32>
    %c1 = arith.constant 1 : index
    %c0_12 = arith.constant 0 : index
    %27 = vector.load %arg2[%c1, %c0_12] : memref<3x128xf32, #tpu.memory_space<vmem>>, vector<1x128xf32>
    %c2 = arith.constant 2 : index
    %c0_13 = arith.constant 0 : index
    %28 = vector.load %arg2[%c2, %c0_13] : memref<3x128xf32, #tpu.memory_space<vmem>>, vector<1x128xf32>
    %cst_14 = arith.constant 9.99999974E-6 : f32
    %29 = vector.broadcast %cst_14 : f32 to vector<1x128xf32>
    %30 = arith.addf %25, %29 : vector<1x128xf32>
    %31 = math.rsqrt %30 : vector<1x128xf32>
    %32 = arith.mulf %26, %31 : vector<1x128xf32>
    %33 = vector.broadcast %16 : vector<1x128xf32> to vector<8x128xf32>
    %34 = arith.subf %12, %33 : vector<8x128xf32>
    %35 = vector.broadcast %32 : vector<1x128xf32> to vector<8x128xf32>
    %36 = arith.mulf %34, %35 : vector<8x128xf32>
    %37 = vector.broadcast %27 : vector<1x128xf32> to vector<8x128xf32>
    %38 = arith.addf %36, %37 : vector<8x128xf32>
    %cst_15 = arith.constant 0.000000e+00 : f32
    %39 = vector.broadcast %cst_15 : f32 to vector<8x128xf32>
    %40 = arith.maximumf %38, %39 : vector<8x128xf32>
    %c0_16 = arith.constant 0 : index
    %c0_17 = arith.constant 0 : index
    %41 = vector.load %arg3[%c0_16, %c0_17] : memref<128x128xf32, #tpu.memory_space<vmem>>, vector<128x128xf32>
    %cst_18 = arith.constant dense<0.000000e+00> : vector<8x128xf32>
    %42 = tpu.matmul %40, %41, %cst_18 {dimension_numbers = #tpu.dot_dimension_numbers<[1], [0], [0], [1], [0, 0, 1, 1], [], []>} : vector<8x128xf32>, vector<128x128xf32>, vector<8x128xf32> -> vector<8x128xf32>
    %43 = vector.broadcast %28 : vector<1x128xf32> to vector<8x128xf32>
    %44 = arith.addf %42, %43 : vector<8x128xf32>
    %c0_19 = arith.constant 0 : index
    %c0_20 = arith.constant 0 : index
    %45 = vector.load %arg4[%c0_19, %c0_20] : memref<8x128xf32, #tpu.memory_space<vmem>>, vector<8x128xf32>
    tpu.vector_store %arg4[%c0_19, %c0_20], %44 {strides = array<i32>} : memref<8x128xf32, #tpu.memory_space<vmem>>, vector<8x128xf32>,
    return
  }
}

</mosaic_0001>

<bundles_post_ra>
// kernel: tpu_custom_call.1
= control target key start
LH: loop header
LB: loop body
LE: loop exit
PB: predicated region body
PF: predicated region fallthrough
CT: control target
= control target key end

     0   :  { %9 = vsyncpa [#allocation3], 0  ;;  %s396_s0 = inlined_call_operand.hbm [shape: f32[3,8,32], index: 0, kind: input, shape index: {}]   ;;  %s397_s1 = inlined_call_operand.hbm [shape: f32[32,128], index: 1, kind: input, shape index: {}]   ;;  %s398_s2 = inlined_call_operand.hbm [shape: f32[3,128], index: 2, kind: input, shape index: {}]   ;;  %s399_s3 = inlined_call_operand.hbm [shape: f32[128,128], index: 3, kind: input, shape index: {}]   ;;  %s400_s4 = inlined_call_operand.hbm [shape: f32[8,128], index: 4, kind: output, shape index: {}]  }
   0x1   :  { %10 = vsyncpa [#allocation6], 0 }
   0x2   :  { %11 = vsyncpa [#allocation9], 0 }
   0x3   :  { %12 = vsyncpa [#allocation4], 0  ;;  %s30_s17 = sshll.u32 %s397_s1, 4  ;;  %s349_s18 = smov [#allocation5]   ;;  %s31_s17 = int_to_ptr.hbm [resolvable:$true] %s30_s17 }
   0x4   :  { %s32_s19 = sshll.u32 %s349_s18, 4  ;;  %s17_s22 = sshll.u32 %s396_s0, 4  ;;  %s33_s19 = int_to_ptr.vmem [resolvable:$true] %s32_s19  ;;  %s18_s22 = int_to_ptr.hbm [resolvable:$true] %s17_s22 }
   0x5   :  { %s350_s23 = smov 128   ;;  %s351_s24 = smov 8  }
   0x6   :  { %38 = dma.hbm_to_vmem [thread:$0]  %s31_s17, 512, %s33_s19, [#allocation6], %s350_s23, %s350_s23, %s351_s24  }
   0x7   :  { %s352_s25 = smov [#allocation2]   ;;  %s44_s29 = sshll.u32 %s398_s2, 4  ;;  %s45_s29 = int_to_ptr.hbm [resolvable:$true] %s44_s29 }
   0x8   :  { %s19_s26 = sshll.u32 %s352_s25, 4  ;;  %s54_s5 = sshll.u32 %s399_s3, 4  ;;  %s20_s26 = int_to_ptr.vmem [resolvable:$true] %s19_s26  ;;  %s55_s5 = int_to_ptr.hbm [resolvable:$true] %s54_s5 }
   0x9   :  { %25 = dma.hbm_to_vmem [thread:$0]  %s18_s22, 384, %s20_s26, [#allocation3], %s350_s23, %s350_s23, %s351_s24  }
   0xa   :  { %s353_s6 = smov [#allocation7]   ;;  %s354_s0 = smov [#allocation8]  }
   0xb   :  { %s46_s7 = sshll.u32 %s353_s6, 4  ;;  %s56_s8 = sshll.u32 %s354_s0, 4  ;;  %s47_s7 = int_to_ptr.vmem [resolvable:$true] %s46_s7  ;;  %s57_s8 = int_to_ptr.vmem [resolvable:$true] %s56_s8 }
   0xc   :  { %49 = dma.hbm_to_vmem [thread:$0]  %s45_s29, 64, %s47_s7, [#allocation6]  }
   0xd   :  { %62 = dma.hbm_to_vmem [thread:$0]  %s55_s5, 2048, %s57_s8, [#allocation9], %s350_s23, %s350_s23, %s351_s24  }
   0xe   :  { %341 = dma.done.wait [#allocation3], 384  }
   0xf   :  { %342 = vsyncadd [#allocation3], 4294966912 }
  0x10   :  { %343 = dma.done.wait [#allocation6], 576  }
  0x11   :  { %344 = vsyncadd [#allocation6], 4294966720 }
  0x12   :  { %345 = dma.done.wait [#allocation9], 2048  }
  0x13   :  { %346 = vsyncadd [#allocation9], 4294965248  ;;  %v88_v0 = vld [vmem:[#allocation5 + $0x18] sm:$0xff]  ;;  %v87_v1 = vld [vmem:[#allocation5 + $0x10] sm:$0xff]  ;;  %vm89_vm0 = vcmask 261120   ;;  %s355_s2 = smov [#allocation10]  }
  0x14   :  { %105 = vmatpush.msra.mxu0 %v88_v0  ;;  %v86_v2 = vld [vmem:[#allocation5 + $0x8] sm:$0xff]  ;;  %v80_v4 = vld [vmem:[#allocation2 + $0x8] sm:$0xff]  ;;  %v81_v5 = vld [vmem:[#allocation2 + $0x10] sm:$0xff]  ;;  %s195_s3 = sshll.u32 %s355_s2, 4  ;;  %s197_s11 = sshll.u32 %s400_s4, 4  ;;  %s196_s3 = int_to_ptr.vmem [resolvable:$true] %s195_s3  ;;  %s198_s11 = int_to_ptr.hbm [resolvable:$true] %s197_s11 }
  0x15   :  { %v79_v3 = vld [vmem:[#allocation2] sm:$0xff]  ;;  %v85_v7 = vld [vmem:[#allocation5] sm:$0xff]  ;;  %v166_v11 = vld [vmem:[#allocation8 + $0x70] sm:$0xff] }
  0x16   :  { %v82_v6 = vadd.f32 %v80_v4, %v79_v3  ;;  %106 = vmatpush.msra.mxu0 %v87_v1  ;;  %v167_v10 = vld [vmem:[#allocation8 + $0x78] sm:$0xff]  ;;  %v165_v12 = vld [vmem:[#allocation8 + $0x68] sm:$0xff]  ;;  %v164_v13 = vld [vmem:[#allocation8 + $0x60] sm:$0xff] }
  0x17   :  { %169 = vmatpush.msra.mxu1 %v167_v10  ;;  %v163_v14 = vld [vmem:[#allocation8 + $0x58] sm:$0xff]  ;;  %v162_v15 = vld [vmem:[#allocation8 + $0x50] sm:$0xff]  ;;  %v161_v16 = vld [vmem:[#allocation8 + $0x48] sm:$0xff] }
  0x18   :  { %v83_v8 = vadd.f32 %v82_v6, %v81_v5  ;;  %107 = vmatpush.msra.mxu0 %v86_v2  ;;  %v160_v17 = vld [vmem:[#allocation8 + $0x40] sm:$0xff]  ;;  %v159_v21 = vld [vmem:[#allocation8 + $0x38] sm:$0xff]  ;;  %v158_v24 = vld [vmem:[#allocation8 + $0x30] sm:$0xff] }
  0x19   :  { %170 = vmatpush.msra.mxu1 %v166_v11  ;;  %v157_v27 = vld [vmem:[#allocation8 + $0x28] sm:$0xff]  ;;  %v156_v30 = vld [vmem:[#allocation8 + $0x20] sm:$0xff]  ;;  %v155_v33 = vld [vmem:[#allocation8 + $0x18] sm:$0xff] }
  0x1a   :  { %v84_v9 = vmul.f32 0.33333334, %v83_v8  ;;  %108 = vmatpush.msra.mxu0 %v85_v7  ;;  %v154_v36 = vld [vmem:[#allocation8 + $0x10] sm:$0xff]  ;;  %v153_v39 = vld [vmem:[#allocation8 + $0x8] sm:$0xff]  ;;  %v152_v42 = vld [vmem:[#allocation8] sm:$0xff] }
  0x1b   :  { %171 = vmatpush.msra.mxu1 %v165_v12  ;;  %v131_v51 = vld [vmem:[#allocation7] sm:$0x1]  ;;  %v217_v57 = vld [vmem:[#allocation7 + $0x1] ss:$0 sm:$0xff]  ;;  %v218_v61 = vld [vmem:[#allocation7 + $0x2] ss:$0 sm:$0xff] }
  0x1c   :  { %209 = vmatmul.msk.f32.vlgmr.msra.gmra.mxu0 %vm89_vm0, %v84_v9 }
  0x1d   :  { %172 = vmatpush.msra.mxu1 %v164_v13 }
  0x1f   :  { %173 = vmatpush.msra.mxu1 %v163_v14 }
  0x21   :  { %174 = vmatpush.msra.mxu1 %v162_v15 }
  0x23   :  { %175 = vmatpush.msra.mxu1 %v161_v16 }
  0x25   :  { %176 = vmatpush.msra.mxu1 %v160_v17 }
  0x27   :  { %177 = vmatpush.msra.mxu1 %v159_v21 }
  0x29   :  { %178 = vmatpush.msra.mxu1 %v158_v24 }
  0x2b   :  { %179 = vmatpush.msra.mxu1 %v157_v27 }
  0x2d   :  { %180 = vmatpush.msra.mxu1 %v156_v30 }
  0x2f   :  { %181 = vmatpush.msra.mxu1 %v155_v33 }
  0x31   :  { %182 = vmatpush.msra.mxu1 %v154_v36 }
  0x33   :  { %183 = vmatpush.msra.mxu1 %v153_v39 }
  0x35   :  { %184 = vmatpush.msra.mxu1 %v152_v42 }
  0x99   :  { %v110_v18 = vpop.f32.mrf.mxu0 }
  0x9a   :  { %v113_v19 = vrot.slane %v110_v18, 4  ;;  %v120_v20 = vmul.f32 %v110_v18, %v110_v18 }
  0x9c   :  { %v114_v22 = vadd.f32 %v113_v19, %v110_v18  ;;  %v121_v23 = vrot.slane %v120_v20, 4 }
  0x9e   :  { %v115_v25 = vrot.slane %v114_v22, 2  ;;  %v122_v26 = vadd.f32 %v121_v23, %v120_v20 }
  0xa0   :  { %v116_v28 = vadd.f32 %v115_v25, %v114_v22  ;;  %v123_v29 = vrot.slane %v122_v26, 2 }
  0xa2   :  { %v117_v31 = vrot.slane %v116_v28, 1  ;;  %v124_v32 = vadd.f32 %v123_v29, %v122_v26 }
  0xa4   :  { %v118_v34 = vadd.f32 %v117_v31, %v116_v28  ;;  %v125_v35 = vrot.slane %v124_v32, 1 }
  0xa6   :  { %v119_v37 = vmul.f32 0.125, %v118_v34  ;;  %v126_v38 = vadd.f32 %v125_v35, %v124_v32 }
  0xa8   :  { %v127_v40 = vmul.f32 0.125, %v126_v38  ;;  %v128_v41 = vmul.f32 %v119_v37, %v119_v37  ;;  %v146_v55 = vsub.f32 %v110_v18, %v119_v37 }
  0xaa   :  { %v129_v43 = vsub.f32 %v127_v40, %v128_v41 }
  0xac   :  { %v130_v44 = vmax.f32 %v129_v43, 0.0 }
  0xae   :  { %v134_v45 = vadd.f32 1e-05, %v130_v44 }
  0xb0   :  { %219 = vrsqrt.f32 %v134_v45  ;;  %vm141_vm2 = vweird.f32 %v134_v45 }
  0xb6   :  { %v220_v46 = vpop.eup %219 }
  0xb7   :  { %v136_v47 = vmul.f32 %v220_v46, %v134_v45  ;;  %vm142_vm1 = vweird.f32 %v220_v46 }
  0xb8   :  { %vm143_vm3 = vmor %vm141_vm2, %vm142_vm1 }
  0xb9   :  { %v137_v48 = vmul.f32 %v220_v46, %v136_v47 }
  0xbb   :  { %v138_v49 = vmul.f32 0.5, %v137_v48 }
  0xbd   :  { %v139_v50 = vsub.f32 1.5, %v138_v49 }
  0xbf   :  { %v140_v52 = vmul.f32 %v220_v46, %v139_v50 }
  0xc1   :  { %v144_v53 = vsel %vm143_vm3, %v220_v46, %v140_v52 }
  0xc2   :  { %v145_v54 = vmul.f32 %v144_v53, %v131_v51 }
  0xc4   :  { %v147_v56 = vperm.slane %v145_v54, 0 }
  0xc6   :  { %v148_v58 = vmul.f32 %v147_v56, %v146_v55 }
  0xc8   :  { %v150_v59 = vadd.f32 %v217_v57, %v148_v58 }
  0xca   :  { %v151_v60 = vmax.f32 %v150_v59, 0.0 }
  0xcc   :  { %185 = vmatmul.f32.vlgmr.msra.gmra.mxu1 %v151_v60 }
 0x149   :  { %v186_v62 = vpop.f32.mrf.mxu1 }
 0x14a   :  { %v187_v63 = vadd.f32 %v218_v61, %v186_v62 }
 0x14c   :  { %189 = vst [vmem:[#allocation10] sm:$0xff] %v187_v63 }
 0x14d   :  { %200 = dma.vmem_to_hbm [thread:$0]  %s196_s3, 128, %s198_s11, [#allocation4]  }
 0x14e   :  { %347 = dma.done.wait [#allocation4], 128  }
 0x14f   :  { %348 = vsyncadd [#allocation4], 4294967168 }
 0x150   :  { %205 = vsyncpa [#allocation3], 1 }
 0x151   :  { %206 = vsyncpa [#allocation6], 1 }
 0x152   :  { %207 = vsyncpa [#allocation9], 1 }
 0x153   :  { %208 = vsyncpa [#allocation4], 1 }

</bundles_post_ra>
